<compile_context>
chip_gen: v7x
topology: tpu7x:2x2x1
jax: 0.10.0
libtpu: 0.0.40
codegen_flags: <defaults>
</compile_context>

<pallas_src>
import functools

import jax
import jax.numpy as jnp
from jax.experimental import pallas as pl
from jax.experimental.pallas import tpu as pltpu

EPS = 1e-6


def _residual_kernel(x_ref, alpha_ref, beta_ref, w_ref, b_ref, o_ref, normed_ref):
    """One (row-tile i, N-tile j) grid step.

    x_ref:      (tr, F)  activation tile (constant index across j -> stays in VMEM)
    alpha_ref:  (1, F)   LayerNorm scale (resident, single-buffered)
    beta_ref:   (1, F)   LayerNorm shift (resident, single-buffered)
    w_ref:      (F, tn)  sublayer weight tile (bf16)
    b_ref:      (1, tn)  sublayer bias tile
    o_ref:      (tr, tn) output tile
    normed_ref: (tr, F)  bf16 scratch: LayerNorm output, computed at j == 0 only
    """
    j = pl.program_id(1)
    f = x_ref.shape[-1]
    tn = o_ref.shape[-1]

    @pl.when(j == 0)
    def _():
        # LayerNorm with torch.std semantics (ddof=1; eps added to std).
        # One-pass statistics: sum(x) and sum(x*x) instead of mean-then-center.
        x = x_ref[...].astype(jnp.float32)
        sum_x = jnp.sum(x, axis=-1, keepdims=True)
        sum_x2 = jnp.sum(x * x, axis=-1, keepdims=True)
        mean = sum_x * (1.0 / f)
        var = jnp.maximum(sum_x2 - sum_x * mean, 0.0) * (1.0 / max(f - 1, 1))
        inv_std = pl.reciprocal(jnp.sqrt(var) + EPS, approx=True)   # EUP slot
        normed = alpha_ref[...] * ((x - mean) * inv_std) + beta_ref[...]
        normed_ref[...] = normed.astype(normed_ref.dtype)

    # sublayer: Linear(F -> F), N-tiled. bf16 operands, f32 MXU accumulation.
    y = jnp.dot(normed_ref[...], w_ref[...], preferred_element_type=jnp.float32)
    y = y + b_ref[...]

    # dropout (eval mode -> identity) + residual add on the matching x columns.
    col0 = pl.multiple_of(j * tn, 128) if tn < f else 0
    x_cols = x_ref[:, pl.ds(col0, tn)].astype(jnp.float32)
    o_ref[...] = (x_cols + y).astype(o_ref.dtype)


def _round_down(v, m):
    return max(m, (v // m) * m)


def _round_up(v, m):
    return ((v + m - 1) // m) * m


def _spec(shape, index_map, mode=None):
    if mode is None:
        return pl.BlockSpec(shape, index_map)
    return pl.BlockSpec(shape, index_map, pipeline_mode=mode)


def residual_connection(x, alpha, beta, w, b, *, tile_rows=1024, n_tile=None,
                        donate_x=False):
    """x: (B, S, F) f32 or bf16. alpha/beta/b: (F,). w: (F, F), ideally bf16."""
    B, S, F = x.shape
    R = B * S
    x2 = x.reshape(R, F)                           # view; no pad, no HBM copy
    out_dtype = x.dtype
    x_bytes = jnp.dtype(x.dtype).itemsize

    # Row tile: sublane multiple (16 for 16-bit activations, else 8), as large
    # as VMEM allows, but with >= 2 grid steps so both v7x TensorCores get work.
    sub = 16 if x_bytes == 2 else 8
    tr = _round_down(min(tile_rows, R), sub)
    if R >= 2 * sub:
        tr = min(tr, _round_up(pl.cdiv(R, 2), sub))

    # Per-generation VMEM cap: ~80% of physical (v5e/v6e 128 MiB, v7x 64 MiB).
    try:
        vmem_cap = int(0.80 * pltpu.get_tpu_info().vmem_capacity_bytes)
    except Exception:  # pragma: no cover - conservative fallback
        vmem_cap = int(0.80 * 64 * 1024 * 1024)

    # Caller should pass W already in bf16 (or call under jit) so this is free.
    w_bf16 = w if w.dtype == jnp.bfloat16 else w.astype(jnp.bfloat16)

    def budget(tr_, tn_, w_bufs_):
        x_tile = 2 * tr_ * F * x_bytes                        # double-buffered
        o_tile = 2 * tr_ * tn_ * jnp.dtype(out_dtype).itemsize
        w_tile = w_bufs_ * F * tn_ * 2                        # bf16 weight tile(s)
        scratch = tr_ * F * 2                                 # bf16 normed scratch
        params = 2 * F * 4 + w_bufs_ * tn_ * 4                # alpha/beta + bias
        return int(1.25 * (x_tile + o_tile + w_tile + scratch + params))

    # Pick the weight tiling: keep the whole bf16 W resident (single-buffered)
    # when it fits; shrink the row tile (down to 256 rows) first, then fall back
    # to N-tiling W along a second grid axis.
    tn, w_bufs = F, 1
    if n_tile is not None:
        tn = int(n_tile)
        w_bufs = 1 if tn == F else 2
    else:
        while budget(tr, tn, w_bufs) > vmem_cap and tr > 256:
            tr = _round_down(tr // 2, sub)
        if budget(tr, tn, w_bufs) > vmem_cap and F % 128 == 0 and F > 128:
            w_bufs = 2
            units = F // 128
            tn = 128
            for g in range(min(units, 8), 0, -1):             # tn divides F
                if units % g == 0 and budget(tr, 128 * g, w_bufs) <= vmem_cap:
                    tn = 128 * g
                    break
        while budget(tr, tn, w_bufs) > vmem_cap and tr > sub:
            tr = _round_down(tr // 2, sub)
        # TODO(synk): for extreme F where even a (F, 128) bf16 weight tile
        # overflows VMEM, add K tiling of the matmul with an f32 accumulator.

    vmem_bytes = min(max(budget(tr, tn, w_bufs), 1 << 20), vmem_cap)

    grid = (pl.cdiv(R, tr), pl.cdiv(F, tn))
    resident = pl.Buffered(1)                      # constant-index: one buffer
    w_mode = resident if w_bufs == 1 else None     # streamed W keeps 2 buffers

    alpha2 = alpha.reshape(1, F).astype(jnp.float32)
    beta2 = beta.reshape(1, F).astype(jnp.float32)
    b2 = b.reshape(1, F).astype(jnp.float32)

    out2 = pl.pallas_call(
        _residual_kernel,
        out_shape=jax.ShapeDtypeStruct((R, F), out_dtype),
        grid_spec=pltpu.PrefetchScalarGridSpec(
            num_scalar_prefetch=0,
            grid=grid,
            in_specs=[
                pl.BlockSpec((tr, F), lambda i, j: (i, 0)),        # x (reused over j)
                _spec((1, F), lambda i, j: (0, 0), resident),      # alpha
                _spec((1, F), lambda i, j: (0, 0), resident),      # beta
                _spec((F, tn), lambda i, j: (0, j), w_mode),       # W (bf16)
                _spec((1, tn), lambda i, j: (0, j), w_mode),       # bias
            ],
            out_specs=pl.BlockSpec((tr, tn), lambda i, j: (i, j)),
            scratch_shapes=[pltpu.VMEM((tr, F), jnp.bfloat16)],    # normed cache
        ),
        compiler_params=pltpu.CompilerParams(
            dimension_semantics=("parallel", "arbitrary"),
            vmem_limit_bytes=vmem_bytes,
        ),
        input_output_aliases=({0: 0} if donate_x else {}),
    )(x2, alpha2, beta2, w_bf16, b2)

    return out2.reshape(B, S, F)


def _reference(x, alpha, beta, w, b):
    """Pure-JAX reference (matmul operands cast to bf16 to match the kernel)."""
    x32 = x.astype(jnp.float32)
    f = x32.shape[-1]
    mean = jnp.mean(x32, axis=-1, keepdims=True)
    var = jnp.sum((x32 - mean) ** 2, axis=-1, keepdims=True) / max(f - 1, 1)
    normed = alpha * ((x32 - mean) / (jnp.sqrt(var) + EPS)) + beta
    y = jnp.dot(normed.astype(jnp.bfloat16), w.astype(jnp.bfloat16),
                preferred_element_type=jnp.float32) + b
    return (x32 + y).astype(x.dtype)


if __name__ == "__main__":
    key = jax.random.PRNGKey(0)
    kx1, kw1, kb1, kx2, kw2, kb2, kx3 = jax.random.split(key, 7)

    # Case 1: f32 activations, F = 128 (resident W, single N tile).
    B, S, F = 2, 8, 128
    x = jax.random.normal(kx1, (B, S, F), dtype=jnp.float32)
    alpha = jnp.ones((F,), jnp.float32)                 # module init: ones
    beta = jnp.ones((F,), jnp.float32)                  # module init: ones
    w = (jax.random.normal(kw1, (F, F), jnp.float32) * 0.05).astype(jnp.bfloat16)
    b = jax.random.normal(kb1, (F,), jnp.float32) * 0.05

    out = jax.block_until_ready(jax.jit(residual_connection)(x, alpha, beta, w, b))
    ref = _reference(x, alpha, beta, w, b)
    assert jnp.allclose(out, ref, atol=2e-2, rtol=2e-2), "case 1 mismatch"

    # Case 2: bf16 activations, F = 256, forced N tiling (tn=128) to exercise the
    # multi-j path: bf16 normed scratch reuse + lane-offset residual slice.
    B2, S2, F2 = 2, 8, 256
    x_b = jax.random.normal(kx2, (B2, S2, F2), dtype=jnp.bfloat16)
    alpha2 = jnp.ones((F2,), jnp.float32)
    beta2 = jnp.ones((F2,), jnp.float32)
    w2 = (jax.random.normal(kw2, (F2, F2), jnp.float32) * 0.05).astype(jnp.bfloat16)
    b2 = jax.random.normal(kb2, (F2,), jnp.float32) * 0.05

    fn2 = jax.jit(functools.partial(residual_connection, n_tile=128))
    out2 = jax.block_until_ready(fn2(x_b, alpha2, beta2, w2, b2))
    ref2 = _reference(x_b, alpha2, beta2, w2, b2)
    assert jnp.allclose(out2.astype(jnp.float32), ref2.astype(jnp.float32),
                        atol=6e-2, rtol=6e-2), "case 2 mismatch"

    # Case 3: ragged row count (R = 3*5 = 15): masked last row block, no pad/slice.
    x_r = jax.random.normal(kx3, (3, 5, F), dtype=jnp.float32)
    out3 = jax.block_until_ready(jax.jit(residual_connection)(x_r, alpha, beta, w, b))
    ref3 = _reference(x_r, alpha, beta, w, b)
    assert jnp.allclose(out3, ref3, atol=2e-2, rtol=2e-2), "case 3 mismatch"

    print("KERNEL_OK")
</pallas_src>

<mosaic_0001>
module attributes {stable_mosaic.version = 11 : i64} {
  func.func @_residual_kernel(%arg0: i32, %arg1: i32, %arg2: memref<8x128xf32, #tpu.memory_space<vmem>>, %arg3: memref<1x128xf32, #tpu.memory_space<vmem>>, %arg4: memref<1x128xf32, #tpu.memory_space<vmem>>, %arg5: memref<128x128xbf16, #tpu.memory_space<vmem>>, %arg6: memref<1x128xf32, #tpu.memory_space<vmem>>, %arg7: memref<8x128xf32, #tpu.memory_space<vmem>>, %arg8: memref<8x128xbf16, #tpu.memory_space<vmem>>) attributes {dimension_semantics = [#tpu.dimension_semantics<parallel>, #tpu.dimension_semantics<arbitrary>], iteration_bounds = array<i64: 2, 1>, scalar_prefetch = 0 : i64, scratch_operands = 1 : i64, tpu.core_type = #tpu.core_type<tc>, window_params = [{transform_indices = @transform_0, window_bounds = array<i64: 8, 128>}, {pipeline_mode = #tpu.pipeline_mode<synchronous>, transform_indices = @transform_1, window_bounds = array<i64: 1, 128>}, {pipeline_mode = #tpu.pipeline_mode<synchronous>, transform_indices = @transform_2, window_bounds = array<i64: 1, 128>}, {pipeline_mode = #tpu.pipeline_mode<synchronous>, transform_indices = @transform_3, window_bounds = array<i64: 128, 128>}, {pipeline_mode = #tpu.pipeline_mode<synchronous>, transform_indices = @transform_4, window_bounds = array<i64: 1, 128>}, {transform_indices = @transform_5, window_bounds = array<i64: 8, 128>}]} {
    %c0_i32 = arith.constant 0 : i32
    %0 = arith.cmpi eq, %arg1, %c0_i32 : i32
    %1 = arith.extui %0 : i1 to i32
    %c0_i32_0 = arith.constant 0 : i32
    %2 = arith.cmpi ne, %1, %c0_i32_0 : i32
    scf.if %2 {
      %c0_10 = arith.constant 0 : index
      %c0_11 = arith.constant 0 : index
      %12 = vector.load %arg2[%c0_10, %c0_11] : memref<8x128xf32, #tpu.memory_space<vmem>>, vector<8x128xf32>
      %cst_12 = arith.constant dense<0.000000e+00> : vector<8xf32>
      %13 = vector.multi_reduction <add>, %12, %cst_12 [1] : vector<8x128xf32> to vector<8xf32>
      %14 = vector.shape_cast %13 : vector<8xf32> to vector<8x1xf32>
      %15 = arith.mulf %12, %12 : vector<8x128xf32>
      %cst_13 = arith.constant dense<0.000000e+00> : vector<8xf32>
      %16 = vector.multi_reduction <add>, %15, %cst_13 [1] : vector<8x128xf32> to vector<8xf32>
      %17 = vector.shape_cast %16 : vector<8xf32> to vector<8x1xf32>
      %cst_14 = arith.constant 7.812500e-03 : f32
      %18 = vector.broadcast %cst_14 : f32 to vector<8x1xf32>
      %19 = arith.mulf %14, %18 : vector<8x1xf32>
      %20 = arith.mulf %14, %19 : vector<8x1xf32>
      %21 = arith.subf %17, %20 : vector<8x1xf32>
      %cst_15 = arith.constant 0.000000e+00 : f32
      %22 = vector.broadcast %cst_15 : f32 to vector<8x1xf32>
      %23 = arith.maximumf %21, %22 : vector<8x1xf32>
      %cst_16 = arith.constant 0.00787401571 : f32
      %24 = vector.broadcast %cst_16 : f32 to vector<8x1xf32>
      %25 = arith.mulf %23, %24 : vector<8x1xf32>
      %26 = math.sqrt %25 : vector<8x1xf32>
      %cst_17 = arith.constant 9.99999997E-7 : f32
      %27 = vector.broadcast %cst_17 : f32 to vector<8x1xf32>
      %28 = arith.addf %26, %27 : vector<8x1xf32>
      %29 = tpu.reciprocal %28 {approx = true} : vector<8x1xf32> -> vector<8x1xf32>
      %c0_18 = arith.constant 0 : index
      %c0_19 = arith.constant 0 : index
      %30 = vector.load %arg3[%c0_18, %c0_19] : memref<1x128xf32, #tpu.memory_space<vmem>>, vector<1x128xf32>
      %31 = vector.broadcast %19 : vector<8x1xf32> to vector<8x128xf32>
      %32 = arith.subf %12, %31 : vector<8x128xf32>
      %33 = vector.broadcast %29 : vector<8x1xf32> to vector<8x128xf32>
      %34 = arith.mulf %32, %33 : vector<8x128xf32>
      %35 = vector.broadcast %30 : vector<1x128xf32> to vector<8x128xf32>
      %36 = arith.mulf %35, %34 : vector<8x128xf32>
      %c0_20 = arith.constant 0 : index
      %c0_21 = arith.constant 0 : index
      %37 = vector.load %arg4[%c0_20, %c0_21] : memref<1x128xf32, #tpu.memory_space<vmem>>, vector<1x128xf32>
      %38 = vector.broadcast %37 : vector<1x128xf32> to vector<8x128xf32>
      %39 = arith.addf %36, %38 : vector<8x128xf32>
      %40 = arith.truncf %39 : vector<8x128xf32> to vector<8x128xbf16>
      %c0_22 = arith.constant 0 : index
      %c0_23 = arith.constant 0 : index
      %41 = vector.load %arg8[%c0_22, %c0_23] : memref<8x128xbf16, #tpu.memory_space<vmem>>, vector<8x128xbf16>
      tpu.vector_store %arg8[%c0_22, %c0_23], %40 {strides = array<i32>} : memref<8x128xbf16, #tpu.memory_space<vmem>>, vector<8x128xbf16>,
    } else {
    }
    %c0 = arith.constant 0 : index
    %c0_1 = arith.constant 0 : index
    %3 = vector.load %arg8[%c0, %c0_1] : memref<8x128xbf16, #tpu.memory_space<vmem>>, vector<8x128xbf16>
    %c0_2 = arith.constant 0 : index
    %c0_3 = arith.constant 0 : index
    %4 = vector.load %arg5[%c0_2, %c0_3] : memref<128x128xbf16, #tpu.memory_space<vmem>>, vector<128x128xbf16>
    %cst = arith.constant dense<0.000000e+00> : vector<8x128xf32>
    %5 = tpu.matmul %3, %4, %cst {dimension_numbers = #tpu.dot_dimension_numbers<[1], [0], [0], [1], [0, 0, 1, 1], [], []>} : vector<8x128xbf16>, vector<128x128xbf16>, vector<8x128xf32> -> vector<8x128xf32>
    %c0_4 = arith.constant 0 : index
    %c0_5 = arith.constant 0 : index
    %6 = vector.load %arg6[%c0_4, %c0_5] : memref<1x128xf32, #tpu.memory_space<vmem>>, vector<1x128xf32>
    %7 = vector.broadcast %6 : vector<1x128xf32> to vector<8x128xf32>
    %8 = arith.addf %5, %7 : vector<8x128xf32>
    %c0_6 = arith.constant 0 : index
    %c0_7 = arith.constant 0 : index
    %9 = vector.load %arg2[%c0_6, %c0_7] : memref<8x128xf32, #tpu.memory_space<vmem>>, vector<8x128xf32>
    %10 = arith.addf %9, %8 : vector<8x128xf32>
    %c0_8 = arith.constant 0 : index
    %c0_9 = arith.constant 0 : index
    %11 = vector.load %arg7[%c0_8, %c0_9] : memref<8x128xf32, #tpu.memory_space<vmem>>, vector<8x128xf32>
    tpu.vector_store %arg7[%c0_8, %c0_9], %10 {strides = array<i32>} : memref<8x128xf32, #tpu.memory_space<vmem>>, vector<8x128xf32>,
    return
  }
  func.func @transform_0(%arg0: i32, %arg1: i32) -> (i32, i32) {
    %c0_i32 = arith.constant 0 : i32
    %c0_i32_0 = arith.constant 0 : i32
    return %arg0, %c0_i32 : i32, i32
  }
  func.func @transform_1(%arg0: i32, %arg1: i32) -> (i32, i32) {
    %c0_i32 = arith.constant 0 : i32
    %c0_i32_0 = arith.constant 0 : i32
    %c0_i32_1 = arith.constant 0 : i32
    return %c0_i32, %c0_i32_0 : i32, i32
  }
  func.func @transform_2(%arg0: i32, %arg1: i32) -> (i32, i32) {
    %c0_i32 = arith.constant 0 : i32
    %c0_i32_0 = arith.constant 0 : i32
    %c0_i32_1 = arith.constant 0 : i32
    return %c0_i32, %c0_i32_0 : i32, i32
  }
  func.func @transform_3(%arg0: i32, %arg1: i32) -> (i32, i32) {
    %c0_i32 = arith.constant 0 : i32
    %c0_i32_0 = arith.constant 0 : i32
    return %c0_i32, %arg1 : i32, i32
  }
  func.func @transform_4(%arg0: i32, %arg1: i32) -> (i32, i32) {
    %c0_i32 = arith.constant 0 : i32
    %c0_i32_0 = arith.constant 0 : i32
    return %c0_i32, %arg1 : i32, i32
  }
  func.func @transform_5(%arg0: i32, %arg1: i32) -> (i32, i32) {
    %c0_i32 = arith.constant 0 : i32
    return %arg0, %arg1 : i32, i32
  }
}

</mosaic_0001>

<bundles_post_ra>
// kernel: residual_connection.1
= control target key start
LH: loop header
LB: loop body
LE: loop exit
PB: predicated region body
PF: predicated region fallthrough
CT: control target
= control target key end

     0   :  { %10 = vsyncpa [#allocation4], 0  ;;  %s1130_s0 = inlined_call_operand.hbm [shape: f32[16,128], index: 0, kind: input, shape index: {}]   ;;  %s1131_s1 = inlined_call_operand.vmem [shape: f32[1,128], index: 1, kind: input, shape index: {}]   ;;  %s1132_s2 = inlined_call_operand.vmem [shape: f32[1,128], index: 2, kind: input, shape index: {}]   ;;  %s1133_s3 = inlined_call_operand.hbm [shape: bf16[128,128], index: 3, kind: input, shape index: {}]   ;;  %s1134_s4 = inlined_call_operand.vmem [shape: f32[1,128], index: 4, kind: input, shape index: {}]   ;;  %s1135_s5 = inlined_call_operand.hbm [shape: f32[16,128], index: 5, kind: output, shape index: {}]  }
   0x1   :  { %12 = vsyncpa [#allocation4 + $0x1], 0 }
   0x2   :  { %13 = vsyncpa [#allocation7], 0 }
   0x3   :  { %14 = vsyncpa [#allocation5], 0 }
   0x4   :  { %16 = vsyncpa [#allocation5 + $0x1], 0  ;;  %s896_s18 = smov 0   ;;  %s898_s19 = smov 0  }
   0x5   :  { %s900_s20 = smov 0   ;;  %s902_s21 = smov 0  }
   0x6   :  { %s904_s22 = smov 0   ;;  %s906_s23 = smov 0  }
   0x7 LB: > { %s568_s24 = sadd.s32 4294967295, %s857_s23   ;;  %s569_s25 = sadd.s32 4294967294, %s857_s23   ;;  %s857_s23 = sphi %s906_s23, %s22_s23   ;;  %s853_s22 = sphi %s904_s22, %s1159_s22   ;;  %s849_s21 = sphi %s902_s21, %s1158_s21   ;;  %s845_s20 = sphi %s900_s20, %s1157_s20   ;;  %s841_s19 = sphi %s898_s19, %s1156_s19   ;;  %s837_s18 = sphi %s896_s18, %s1155_s18  }
   0x8   : > { %p54_p0 = scmp.ne.s32.totalorder %s841_s19, %s837_s18  ;;  %p930_p1 = scmp.eq.s32.totalorder %s568_s24, 0 }
   0x9   : > { %p934_p2 = scmp.eq.s32.totalorder %s568_s24, 1  ;;  %p180_p3 = scmp.eq.s32.totalorder %s569_s25, 1 }
   0xa   : > { %s1140_s26 = scalar_select %p930_p1, 1, 0 }
   0xb   : > { %s1141_s27 = scalar_select %p934_p2, 1, 0 }
   0xc   : > { %p940_p4 = por %p930_p1, %p54_p0  ;;  %p570_p5 = scmp.ge.s32.totalorder %s857_s23, 1 }
   0xd   : > { %p945_p6 = por %p180_p3, %p54_p0  ;;  %p187_p7 = scmp.lt.s32.totalorder %s857_s23, 3 }
   0xe   : > { %s1142_s28 = scalar_select %p940_p4, 1, 0 }
   0xf   : > { %s1143_s29 = scalar_select %p945_p6, 1, 0 }
  0x10   : > { %p950_p8 = pnand %p570_p5, %p187_p7  ;;  %s859_s6 = smov [#allocation6]  }
  0x11   : > { %s207_s7 = sshll.u32 %s859_s6, 4  ;;  %s34_s9 = sadd.s32 1, %s853_s22  ;;  %s208_s7 = int_to_ptr.vmem [resolvable:$true] %s207_s7 }
  0x12   : > { %s1144_s30 = scalar_select %p950_p8, 1, 0 }
  0x13   : > { %p632_p9 = pneg %p950_p8  ;;  %s713_s12 = scalar_lea.hbm %s1133_s3, 1024 }
  0x14   : > { %p714_p12 = scmp.ne.s32.totalorder %s1133_s3, %s713_s12  ;;  %p720_p5 = scmp.lt.u32.totalorder %s713_s12, %s1133_s3 }
  0x15   : > { %p959_p11 = pnand %p632_p9, %p930_p1 }
  0x17   : > { %p715_p13 = pneg %p959_p11 }
  0x19   : > { %p716_p0 = pnand %p715_p13, %p714_p12 }
  0x1b   : > { %p717_p3 = pneg %p716_p0 }
  0x1d   : > { %p722_p7 = pnand %p720_p5, %p717_p3 }
  0x1f   : > { %725 = shalt.err (!%p722_p7)
}
  0x20   : > { %s726_s17 = scalar_lea.vmem %s208_s7, 1024  ;;  %p734_p1 = scmp.lt.s32.totalorder %s208_s7, %s208_s7 }
  0x21   : > { %p727_p9 = scmp.ne.s32.totalorder %s208_s7, %s726_s17  ;;  %p735_p4 = scmp.lt.s32.totalorder %s726_s17, %s726_s17 }
  0x23   : > { %p729_p10 = pnand %p727_p9, %p715_p13  ;;  %p736_p8 = por %p735_p4, %p734_p1 }
  0x25   : > { %p730_p6 = pneg %p729_p10 }
  0x27   : > { %p737_p2 = pnand %p736_p8, %p730_p6 }
  0x29   : > { %740 = shalt.err (!%p737_p2)
}
  0x2a   : > { %s860_s24 = smov 64   ;;  %s861_s25 = smov 4  }
  0x2b   : > { %635 = dma.hbm_to_vmem [thread:$0]  (!%p959_p11), %s1133_s3, 1024, %s208_s7, [#allocation7], %s860_s24, %s860_s24, %s861_s25  }
  0x2c   : > { %p36_p1 = scmp.ge.s32.totalorder %s34_s9, 2  ;;  %s41_s11 = sadd.s32 1, %s845_s20 }
  0x2d   : > { %p48_p2 = scmp.ne.s32.totalorder %s845_s20, %s841_s19  ;;  %p49_p4 = scmp.eq.s32.totalorder %s857_s23, 0 }
  0x2e   : > { %s1161_s9 = smov (%p36_p1, %s34_s9), 0  ;;  %p1147_p8 = scmp.ne.s32.totalorder %s1141_s27, 0 }
  0x2f   : > { %p986_p6 = por %p49_p4, %p48_p2  ;;  %s38_s8 = ssub.s32 %s853_s22, %s1161_s9 }
  0x30   : > { %p992_p10 = por %p1147_p8, %p48_p2  ;;  %p645_p12 = scmp.lt.s32.totalorder %s857_s23, 2 }
  0x31   : > { %p39_p11 = scmp.eq.s32.totalorder %s38_s8, 0  ;;  %s227_s7 = sand.u32 1, %s845_s20  }
  0x32   : > { %s574_s14 = sshll.u32 %s227_s7, 3  ;;  %s575_s16 = sshll.u32 %s853_s22, 7 }
  0x33   : > { %s1001_s15 = scalar_select %p39_p11, %s845_s20, %s41_s11  }
  0x34   : > { %s1007_s25 = scalar_lea.hbm %s1130_s0, %s575_s16  ;;  %s231_s27 = scalar_lea.vmem [#allocation3], %s574_s14 }
  0x35   : > { %s238_s6 = sshll.u32 %s231_s27, 4  ;;  %p1013_p13 = pnand %p645_p12, %p986_p6  ;;  %s1009_s6 = int_to_ptr.vmem [resolvable:$true] %s238_s6 }
  0x36   : > { %s228_s11 = scalar_lea.sflag [#allocation4], %s227_s7  ;;  %s741_s8 = scalar_lea.hbm %s1007_s25, 128 }
  0x37   : > { %p742_p0 = scmp.ne.s32.totalorder %s1007_s25, %s741_s8  ;;  %p743_p3 = pneg %p1013_p13 }
  0x38   : > { %s746_s17 = scalar_lea.hbm %s1130_s0, 256  ;;  %p747_p9 = scmp.lt.u32.totalorder %s1007_s25, %s1130_s0 }
  0x39   : > { %p744_p5 = pnand %p743_p3, %p742_p0  ;;  %p748_p1 = scmp.lt.u32.totalorder %s746_s17, %s741_s8 }
  0x3a   : > { %p750_p4 = scmp.lt.u32.totalorder %s741_s8, %s1007_s25 }
  0x3b   : > { %p745_p7 = pneg %p744_p5  ;;  %p749_p2 = por %p748_p1, %p747_p9 }
  0x3d   : > { %p751_p6 = por %p750_p4, %p749_p2 }
  0x3f   : > { %p752_p8 = pnand %p751_p6, %p745_p7 }
  0x41   : > { %755 = shalt.err (!%p752_p8)
}
  0x42   : > { %s756_s7 = scalar_lea.vmem %s1009_s6, 128  ;;  %s862_s27 = smov [#allocation3]  }
  0x43   : > { %p757_p12 = scmp.ne.s32.totalorder %s1009_s6, %s756_s7  ;;  %s761_s14 = sshll.u32 %s862_s27, 4  ;;  %s762_s14 = int_to_ptr.vmem [resolvable:$false] %s761_s14 }
  0x44   : > { %s763_s16 = scalar_lea.vmem %s762_s14, 256  ;;  %p764_p5 = scmp.lt.s32.totalorder %s1009_s6, %s762_s14 }
  0x45   : > { %p759_p11 = pnand %p757_p12, %p743_p3  ;;  %p765_p9 = scmp.lt.s32.totalorder %s763_s16, %s756_s7 }
  0x47   : > { %p760_p0 = pneg %p759_p11  ;;  %p766_p1 = por %p765_p9, %p764_p5 }
  0x49   : > { %p767_p2 = pnand %p766_p1, %p760_p0 }
  0x4b   : > { %770 = shalt.err (!%p767_p2)
}
  0x4c   : > { %639 = dma.hbm_to_vmem [thread:$0]  (!%p1013_p13), %s1007_s25, 128, %s1009_s6, %s228_s11  }
  0x4d   : > { %p1150_p7 = scmp.ne.s32.totalorder %s1144_s30, 0 }
  0x4e   : > { %s1045_s8 = sand.u32 (!%p1150_p7), 1, %s841_s19   ;;  %p1151_p3 = scmp.ne.s32.totalorder (!%p1150_p7), %s1142_s28, 0 }
  0x4f   : > { %247 = sbr.rel (%p1150_p7) target bundleno = 517 (0x205), region = 40  ;;  %s577_s17 = sshll.u32 (!%p1150_p7), %s1045_s8, 3 }
  0x50   : > { %s250_s12 = scalar_lea.sflag (!%p1150_p7), [#allocation4], %s1045_s8  ;;  %s253_s24 = scalar_lea.vmem (!%p1150_p7), [#allocation3], %s577_s17 }
  0x56   : > { %824 = dma.done.wait (%p1151_p3), %s250_s12, 128  }
  0x57   : > { %826 = vsyncadd (%p1151_p3), %s250_s12, 4294967168  ;;  %p1152_p13 = scmp.ne.s32.totalorder %s1140_s26, 0 }
  0x59   : > { %828 = dma.done.wait (%p1152_p13), [#allocation7], 1024  }
  0x5a   : > { %830 = vsyncadd (%p1152_p13), [#allocation7], 4294966272  ;;  %v1059_v0 = vld [vmem:[%s253_s24] sm:$0xff]  ;;  %v701_v2 = vld [vmem:[#allocation6] sm:$0xff]   ;;  %v863_v3 = vmov 0.0   ;;  %vm864_vm0 = vmmov 0  }
  0x5b   : > { %296 = vadd.xlane.f32.xlu0 %v1059_v0  ;;  %v298_v1 = vmul.f32 %v1059_v0, %v1059_v0  ;;  %604 = vmatprep.subr.bf16.mxu0 %v863_v3  ;;  %v702_v4 = vld [vmem:[#allocation6 + $0x8] sm:$0xff]   ;;  %v703_v5 = vld [vmem:[#allocation6 + $0x10] sm:$0xff]   ;;  %v704_v6 = vld [vmem:[#allocation6 + $0x18] sm:$0xff]   ;;  %s592_s11 = sshll.u32 %s849_s21, 7  ;;  %s286_s7 = scalar_lea.vmem [#allocation8], %s577_s17 }
  0x5c   : > { %605 = vmatpush3.bf16.msra.mxu0 %v701_v2  ;;  %v705_v7 = vld [vmem:[#allocation6 + $0x20] sm:$0xff]   ;;  %v706_v8 = vld [vmem:[#allocation6 + $0x28] sm:$0xff]   ;;  %620 = vmatprep.mubr.msk.bf16.mxu0 %vm864_vm0, %v863_v3  ;;  %v707_v9 = vld [vmem:[#allocation6 + $0x30] sm:$0xff]   ;;  %s465_s27 = sshll.u32 %s286_s7, 4  ;;  %s1081_s12 = scalar_lea.hbm %s1135_s5, %s592_s11  ;;  %s1083_s27 = int_to_ptr.vmem [resolvable:$true] %s465_s27 }
  0x5d   : > { %606 = vmatprep.subr.bf16.mxu0 %v863_v3  ;;  %v708_v10 = vld [vmem:[#allocation6 + $0x38] sm:$0xff]   ;;  %v580_v26 = vld [vmem:[%s1131_s1] ss:$0 sm:$0xff]  ;;  %s451_s21 = scalar_lea.sflag [#allocation5], %s1045_s8  ;;  %s771_s17 = scalar_lea.vmem %s1083_s27, 128 }
  0x5e   : > { %v581_v28 = vld [vmem:[%s1132_s2] ss:$0 sm:$0xff]  ;;  %p772_p4 = scmp.ne.s32.totalorder %s1083_s27, %s771_s17  ;;  %s865_s24 = smov [#allocation8]  }
  0x5f   : > { %299 = vadd.xlane.f32.xlu0 %v298_v1  ;;  %v582_v33 = vld [vmem:[%s1134_s4] ss:$0 sm:$0xff]  ;;  %s775_s26 = sshll.u32 %s865_s24, 4  ;;  %s776_s26 = int_to_ptr.vmem [resolvable:$false] %s775_s26 }
  0x60   : > { %607 = vmatpush3.bf16.msra.mxu0 %v702_v4  ;;  %p773_p6 = pnand %p772_p4, %p992_p10  ;;  %s777_s28 = scalar_lea.vmem %s776_s26, 256 }
  0x61   : > { %608 = vmatprep.subr.bf16.mxu0 %v863_v3  ;;  %p778_p12 = scmp.lt.s32.totalorder %s1083_s27, %s776_s26  ;;  %p779_p11 = scmp.lt.s32.totalorder %s777_s28, %s771_s17 }
  0x62   : > { %p774_p8 = pneg %p773_p6 }
  0x63   : > { %p780_p0 = por %p779_p11, %p778_p12 }
  0x64   : > { %609 = vmatpush3.bf16.msra.mxu0 %v703_v5 }
  0x65   : > { %610 = vmatprep.subr.bf16.mxu0 %v863_v3  ;;  %p781_p5 = pnand %p780_p0, %p774_p8 }
  0x68   : > { %611 = vmatpush3.bf16.msra.mxu0 %v704_v6 }
  0x69   : > { %612 = vmatprep.subr.bf16.mxu0 %v863_v3 }
  0x6c   : > { %613 = vmatpush3.bf16.msra.mxu0 %v705_v7 }
  0x6d   : > { %614 = vmatprep.subr.bf16.mxu0 %v863_v3 }
  0x70   : > { %615 = vmatpush3.bf16.msra.mxu0 %v706_v8 }
  0x71   : > { %616 = vmatprep.subr.bf16.mxu0 %v863_v3 }
  0x74   : > { %617 = vmatpush3.bf16.msra.mxu0 %v707_v9 }
  0x75   : > { %618 = vmatprep.subr.bf16.mxu0 %v863_v3 }
  0x78   : > { %619 = vmatpush3.bf16.msra.mxu0 %v708_v10 }
  0xe8   : > { %v297_v11 = vpop.xlane.xlu0 %296 }
  0xe9   : > { %v301_v12 = vmul.f32 0.0078125, %v297_v11 }
  0xeb   : > { %v302_v13 = vmul.f32 %v301_v12, %v297_v11  ;;  %v316_v24 = vsub.f32 %v1059_v0, %v301_v12 }
  0xec   : > { %v300_v14 = vpop.xlane.xlu0 %299 }
  0xed   : > { %v303_v15 = vsub.f32 %v300_v14, %v302_v13 }
  0xef   : > { %v304_v16 = vmax.f32 %v303_v15, 0.0 }
  0xf1   : > { %v305_v17 = vmul.f32 0.007874016, %v304_v16 }
  0xf3   : > { %709 = vrsqrt.f32 %v305_v17  ;;  %vm308_vm1 = vcmp.eq.f32.partialorder %v305_v17, inf  ;;  %v311_v20 = vand.u32 2147483648, %v305_v17  ;;  %vm310_vm2 = vcmp.eq.f32.partialorder %v305_v17, 0.0 }
  0xfd   : > { %v710_v18 = vpop.eup %709 }
  0xfe   : > { %v307_v19 = vmul.f32 %v710_v18, %v305_v17 }
 0x100   : > { %v309_v21 = vsel %vm308_vm1, %v305_v17, %v307_v19 }
 0x101   : > { %v312_v22 = vsel %vm310_vm2, %v311_v20, %v309_v21 }
 0x102   : > { %v313_v23 = vadd.f32 1e-06, %v312_v22 }
 0x104   : > { %711 = vrcp.f32 %v313_v23 }
 0x10e   : > { %v712_v25 = vpop.eup %711 }
 0x10f   : > { %v317_v27 = vmul.f32 %v712_v25, %v316_v24 }
 0x111   : > { %v324_v29 = vmul.f32 %v580_v26, %v317_v27 }
 0x113   : > { %v332_v30 = vadd.f32 %v581_v28, %v324_v29 }
 0x115   : > { %v333_v31 = vpack.c.bf16 %v332_v30, %v332_v30 }
 0x117   : > { %334 = vst [vmem:[#allocation2] sm:$0xf] %v333_v31 }
 0x11e   : > { %v335_v32 = vld [vmem:[#allocation2] sm:$0xf] }
 0x11f   : > { %621 = vmatmul.mubr.bf16.vlgmr.msra.gmra.mrb[0].mxu0 %v335_v32 }
 0x1f2   : > { %v441_v34 = vpop.f32.mrb[0].mxu0 }
 0x1f3   : > { %v442_v35 = vadd.f32 %v582_v33, %v441_v34  ;;  %v622_v36 = vpop.f32.mrb[1].mxu0 }
 0x1f4   : > { %v444_v37 = vpop.f32.mrb[2].mxu0 }
 0x1f5   : > { %v448_v38 = vadd.f32 %v442_v35, %v1059_v0  ;;  %v623_v39 = vpop.f32.mrb[3].mxu0 }
 0x1f7   : > { %449 = vst [vmem:[%s286_s7] sm:$0xff] %v448_v38 }
 0x1f8   : > { %784 = shalt.err (!%p781_p5)
}
 0x1f9   : > { %s785_s8 = scalar_lea.hbm %s1081_s12, 128  ;;  %s789_s6 = scalar_lea.hbm %s1135_s5, 256 }
 0x1fa   : > { %p786_p9 = scmp.ne.s32.totalorder %s1081_s12, %s785_s8  ;;  %p790_p7 = scmp.lt.u32.totalorder %s1081_s12, %s1135_s5 }
 0x1fb   : > { %p791_p3 = scmp.lt.u32.totalorder %s789_s6, %s785_s8  ;;  %p793_p4 = scmp.lt.u32.totalorder %s785_s8, %s1081_s12 }
 0x1fc   : > { %p787_p1 = pnand %p786_p9, %p992_p10 }
 0x1fd   : > { %p792_p13 = por %p791_p3, %p790_p7 }
 0x1fe   : > { %p788_p2 = pneg %p787_p1 }
 0x1ff   : > { %p794_p6 = por %p793_p4, %p792_p13 }
 0x201   : > { %p795_p8 = pnand %p794_p6, %p788_p2 }
 0x203   : > { %798 = shalt.err (!%p795_p8)
}
 0x204   : > { %630 = dma.vmem_to_hbm [thread:$0]  (%p992_p10), %s1083_s27, 128, %s1081_s12, %s451_s21  }
 0x205 PF: > { %s477_s7 = sand.u32 1, %s837_s18   ;;  %p1153_p12 = scmp.ne.s32.totalorder %s1143_s29, 0 }
 0x206   : > { %p1154_p11 = scmp.ge.s32.totalorder %s857_s23, 2  ;;  %s478_s14 = scalar_lea.sflag [#allocation5], %s477_s7 }
 0x208   : > { %p641_p0 = pnand %p1154_p11, %p1153_p12 }
 0x20a   : > { %832 = dma.done.wait (!%p641_p0), %s478_s14, 128  }
 0x20b   : > { %834 = vsyncadd (!%p641_p0), %s478_s14, 4294967168  ;;  %s22_s23 = sadd.s32 1, %s857_s23   ;;  %s1155_s18 = smov %s841_s19 }
 0x20c   : > { %p19_p5 = scmp.ge.s32.totalorder %s22_s23, 4   ;;  %s1156_s19 = smov %s845_s20 }
 0x20d   : > { %s1157_s20 = smov %s1001_s15  ;;  %s1158_s21 = smov %s853_s22 }
 0x20e   : > { %s1159_s22 = smov %s1161_s9  ;;  %21 = sbr.rel (!%p19_p5) target bundleno = 7 (0x7), region = 97 }
 0x215   :  { %483 = vsyncpa [#allocation4], 1 }
 0x216   :  { %485 = vsyncpa [#allocation4 + $0x1], 1 }
 0x217   :  { %486 = vsyncpa [#allocation7], 1 }
 0x218   :  { %487 = vsyncpa [#allocation5], 1 }
 0x219   :  { %489 = vsyncpa [#allocation5 + $0x1], 1 }

</bundles_post_ra>
